<compile_context>
chip_gen: v6e
topology: v6e:2x2x1
jax: 0.10.0
libtpu: 0.0.40
codegen_flags: <defaults>
</compile_context>

<pallas_src>
import math

import jax
import jax.numpy as jnp
from jax.experimental import pallas as pl
from jax.experimental.pallas import tpu as pltpu


# ----------------------------------------------------------------------------
# Kernels
# ----------------------------------------------------------------------------
def _ffn_resident_kernel(x_ref, w1_ref, b1_ref, w2_ref, b2_ref, o_ref):
    """Weights-resident path: full W1/W2 live in VMEM, 1-D grid over rows."""
    h = jnp.dot(x_ref[...], w1_ref[...], preferred_element_type=jnp.float32)
    h = jnp.maximum(h + b1_ref[...].astype(jnp.float32), 0.0)
    # TODO(synk): nn.Dropout is identity in eval/inference; training-mode
    # dropout (pltpu.prng_random_bits mask + rescale) is not implemented.
    y = jnp.dot(h.astype(w2_ref.dtype), w2_ref[...],
                preferred_element_type=jnp.float32)
    o_ref[...] = (y + b2_ref[...].astype(jnp.float32)).astype(o_ref.dtype)


def _ffn_tiled_kernel_f32out(x_ref, w1_ref, b1_ref, w2_ref, b2_ref, o_ref):
    """Tiled hidden-reduction path, f32 output: accumulate directly into the
    resident output block (its block index is constant over j)."""
    j = pl.program_id(1)

    h = jnp.dot(x_ref[...], w1_ref[...], preferred_element_type=jnp.float32)
    h = jnp.maximum(h + b1_ref[...].astype(jnp.float32), 0.0)
    p = jnp.dot(h.astype(w2_ref.dtype), w2_ref[...],
                preferred_element_type=jnp.float32)

    @pl.when(j == 0)
    def _():
        # Init with first partial product, fold in b2 (no zero-fill pass).
        o_ref[...] = p + b2_ref[...].astype(jnp.float32)

    @pl.when(j > 0)
    def _():
        o_ref[...] += p


def _ffn_tiled_kernel_scratch(x_ref, w1_ref, b1_ref, w2_ref, b2_ref, o_ref,
                              acc_ref):
    """Tiled hidden-reduction path for non-f32 outputs: f32 VMEM accumulator,
    cast/store only on the last hidden tile."""
    j = pl.program_id(1)

    h = jnp.dot(x_ref[...], w1_ref[...], preferred_element_type=jnp.float32)
    h = jnp.maximum(h + b1_ref[...].astype(jnp.float32), 0.0)
    p = jnp.dot(h.astype(w2_ref.dtype), w2_ref[...],
                preferred_element_type=jnp.float32)

    @pl.when(j == 0)
    def _():
        acc_ref[...] = p + b2_ref[...].astype(jnp.float32)

    @pl.when(j > 0)
    def _():
        acc_ref[...] += p

    @pl.when(j == pl.num_programs(1) - 1)
    def _():
        o_ref[...] = acc_ref[...].astype(o_ref.dtype)


# ----------------------------------------------------------------------------
# Tiling helpers
# ----------------------------------------------------------------------------
def _round_up(x: int, m: int) -> int:
    return ((x + m - 1) // m) * m


def _pick_tile(n: int, target: int, align: int) -> int:
    """Largest tile <= max(target, align) that is a multiple of `align`.
    Prefers a divisor of n; otherwise the caller must zero-pad n up to a
    multiple of the returned tile (never falls back to a huge full-extent
    block)."""
    if n <= target:
        return _round_up(n, align)
    t = max((target // align) * align, align)
    cand = t
    while cand >= align:
        if n % cand == 0:
            return cand
        cand -= align
    return t  # no divisor <= target: caller pads


def _device_defaults(compute_itemsize: int):
    """Generation-aware tm/th targets and VMEM budget."""
    kind = ""
    try:
        kind = jax.devices()[0].device_kind.lower()
    except Exception:  # pragma: no cover - defensive
        pass
    if "v7" in kind:
        # 64 MiB physical VMEM, 2 TensorCores, roofline knee ~310 flops/byte.
        return dict(tm_target=512, th_target=256,
                    vmem_limit=52 << 20, want_two_row_tiles=True)
    if "v6" in kind:
        # 128 MiB VMEM, knee ~650 flops/byte -> big row tiles.
        tm = 1024 if compute_itemsize <= 2 else 640
        return dict(tm_target=tm, th_target=512,
                    vmem_limit=100 << 20, want_two_row_tiles=False)
    if "v5" in kind:
        # Knee ~240 flops/byte; bigger tm buys little.
        return dict(tm_target=384, th_target=512,
                    vmem_limit=96 << 20, want_two_row_tiles=False)
    # Conservative fallback.
    return dict(tm_target=512, th_target=512,
                vmem_limit=64 << 20, want_two_row_tiles=False)


# ----------------------------------------------------------------------------
# Wrapper
# ----------------------------------------------------------------------------
def feed_forward(x: jnp.ndarray,
                 w1: jnp.ndarray, b1: jnp.ndarray,
                 w2: jnp.ndarray, b2: jnp.ndarray,
                 *,
                 compute_dtype=None,
                 tm_target: int | None = None,
                 th_target: int | None = None,
                 vmem_limit_bytes: int | None = None,
                 weights_resident: bool | None = None) -> jnp.ndarray:
    """y = relu(x @ W1 + b1) @ W2 + b2 ; x: (..., n_embed).

    compute_dtype: optional dtype (e.g. jnp.bfloat16) for x/W1/W2 in the
    matmuls; accumulation and bias/ReLU math stay f32. Default: input dtype.
    """
    orig_shape = x.shape
    out_dtype = x.dtype
    d = orig_shape[-1]
    hdim = w1.shape[1]
    assert w1.shape == (d, hdim) and w2.shape == (hdim, d)
    assert b1.shape == (hdim,) and b2.shape == (d,)

    cdtype = jnp.dtype(compute_dtype) if compute_dtype is not None else jnp.dtype(x.dtype)
    csize = cdtype.itemsize
    osize = jnp.dtype(out_dtype).itemsize

    defaults = _device_defaults(csize)
    if tm_target is None:
        tm_target = defaults["tm_target"]
    if th_target is None:
        th_target = defaults["th_target"]
    if vmem_limit_bytes is None:
        vmem_limit_bytes = defaults["vmem_limit"]
    want_two_row_tiles = defaults["want_two_row_tiles"]

    # Flatten leading dims -> lane-dense 2-D matmul layout (M, D).
    x2d = x.reshape(-1, d).astype(cdtype)
    w1c = w1.astype(cdtype)
    w2c = w2.astype(cdtype)
    b1_2d = b1.reshape(1, hdim).astype(jnp.float32)
    b2_2d = b2.reshape(1, d).astype(jnp.float32)
    m = x2d.shape[0]

    m_align = 16 if csize <= 2 else 8  # bf16 sublane packing vs f32

    weight_bytes = 2 * d * hdim * csize + (hdim + d) * 4
    if weights_resident is None:
        weights_resident = weight_bytes <= vmem_limit_bytes // 4

    # ---------------- weights-resident fast path ----------------------------
    if weights_resident:
        tm = _pick_tile(m, tm_target, m_align)

        def est_res(tm_):
            # weights (counted double-buffered to be safe) + x/out blocks.
            return 2 * weight_bytes + 2 * tm_ * d * (csize + osize)

        while est_res(tm) > 0.8 * vmem_limit_bytes and tm > m_align:
            tm = max(m_align, _round_up(tm // 2, m_align))
        if want_two_row_tiles:  # keep both v7x TensorCores busy
            while _round_up(m, tm) // tm < 2 and tm > m_align:
                tm = max(m_align, _round_up(tm // 2, m_align))

        m_pad = _round_up(m, tm)
        if m_pad != m:
            x2d = jnp.pad(x2d, ((0, m_pad - m), (0, 0)))

        out2d = pl.pallas_call(
            _ffn_resident_kernel,
            out_shape=jax.ShapeDtypeStruct((m_pad, d), out_dtype),
            grid_spec=pltpu.PrefetchScalarGridSpec(
                num_scalar_prefetch=0,
                grid=(m_pad // tm,),
                in_specs=[
                    pl.BlockSpec((tm, d), lambda i: (i, 0)),     # x rows
                    pl.BlockSpec((d, hdim), lambda i: (0, 0)),   # W1 (resident)
                    pl.BlockSpec((1, hdim), lambda i: (0, 0)),   # b1 (resident)
                    pl.BlockSpec((hdim, d), lambda i: (0, 0)),   # W2 (resident)
                    pl.BlockSpec((1, d), lambda i: (0, 0)),      # b2 (resident)
                ],
                out_specs=pl.BlockSpec((tm, d), lambda i: (i, 0)),
            ),
            compiler_params=pltpu.CompilerParams(
                dimension_semantics=("parallel",),
                vmem_limit_bytes=vmem_limit_bytes,
            ),
        )(x2d, w1c, b1_2d, w2c, b2_2d)
        return out2d[:m].reshape(orig_shape)

    # ---------------- tiled path (hidden axis = inner reduction) ------------
    th = _pick_tile(hdim, th_target, 128)
    # Shrink th (not tm) if the double-buffered weight slices alone would blow
    # the VMEM budget: th only sets per-step buffer size, tm sets HBM traffic.
    while 4 * d * th * csize > 0.5 * vmem_limit_bytes and th > 128:
        th = max(128, _round_up(th // 2, 128))

    hdim_pad = _round_up(hdim, th)
    if hdim_pad != hdim:
        # Zero-padding the hidden axis is exact: relu(x@0 + 0) = 0 and the
        # padded W2 rows are 0, so padded hidden units contribute nothing.
        w1c = jnp.pad(w1c, ((0, 0), (0, hdim_pad - hdim)))
        w2c = jnp.pad(w2c, ((0, hdim_pad - hdim), (0, 0)))
        b1_2d = jnp.pad(b1_2d, ((0, 0), (0, hdim_pad - hdim)))

    use_scratch = jnp.dtype(out_dtype) != jnp.float32

    tm = _pick_tile(m, tm_target, m_align)

    def est_tiled(tm_):
        blocks = (tm_ * d * csize        # x tile
                  + d * th * csize       # W1 slice
                  + th * 4               # b1 slice
                  + th * d * csize       # W2 slice
                  + d * 4                # b2
                  + tm_ * d * osize)     # out tile
        total = 2 * blocks               # double buffering
        if use_scratch:
            total += tm_ * d * 4
        return total

    while est_tiled(tm) > 0.8 * vmem_limit_bytes and tm > m_align:
        tm = max(m_align, _round_up(tm // 2, m_align))
    if want_two_row_tiles:
        while _round_up(m, tm) // tm < 2 and tm > m_align:
            tm = max(m_align, _round_up(tm // 2, m_align))

    m_pad = _round_up(m, tm)
    if m_pad != m:
        x2d = jnp.pad(x2d, ((0, m_pad - m), (0, 0)))

    kernel = _ffn_tiled_kernel_scratch if use_scratch else _ffn_tiled_kernel_f32out
    scratch_shapes = [pltpu.VMEM((tm, d), jnp.float32)] if use_scratch else []

    out2d = pl.pallas_call(
        kernel,
        out_shape=jax.ShapeDtypeStruct((m_pad, d), out_dtype),
        grid_spec=pltpu.PrefetchScalarGridSpec(
            num_scalar_prefetch=0,
            grid=(m_pad // tm, hdim_pad // th),     # (row tiles, hidden tiles)
            in_specs=[
                pl.BlockSpec((tm, d), lambda i, j: (i, 0)),   # x rows (resident over j)
                pl.BlockSpec((d, th), lambda i, j: (0, j)),   # W1 hidden slice
                pl.BlockSpec((1, th), lambda i, j: (0, j)),   # b1 hidden slice
                pl.BlockSpec((th, d), lambda i, j: (j, 0)),   # W2 hidden slice
                pl.BlockSpec((1, d), lambda i, j: (0, 0)),    # b2 (resident)
            ],
            out_specs=pl.BlockSpec((tm, d), lambda i, j: (i, 0)),
            scratch_shapes=scratch_shapes,
        ),
        compiler_params=pltpu.CompilerParams(
            dimension_semantics=("parallel", "arbitrary"),
            vmem_limit_bytes=vmem_limit_bytes,
        ),
    )(x2d, w1c, b1_2d, w2c, b2_2d)
    return out2d[:m].reshape(orig_shape)


# ----------------------------------------------------------------------------
# Self-test
# ----------------------------------------------------------------------------
if __name__ == "__main__":
    B, S, n_embed = 2, 8, 64
    hidden = 4 * n_embed

    key = jax.random.PRNGKey(0)
    kx, k1, k2, k3, k4 = jax.random.split(key, 5)
    x = jax.random.normal(kx, (B, S, n_embed), dtype=jnp.float32)
    w1 = jax.random.normal(k1, (n_embed, hidden), dtype=jnp.float32) / math.sqrt(n_embed)
    b1 = jax.random.normal(k2, (hidden,), dtype=jnp.float32) * 0.01
    w2 = jax.random.normal(k3, (hidden, n_embed), dtype=jnp.float32) / math.sqrt(hidden)
    b2 = jax.random.normal(k4, (n_embed,), dtype=jnp.float32) * 0.01

    # Plain-JAX reference (eval mode: dropout == identity).
    ref = jnp.maximum(x @ w1 + b1, 0.0) @ w2 + b2

    # Path 1: auto-dispatch -> weights-resident fast path (small model), f32.
    out = feed_forward(x, w1, b1, w2, b2)
    out = jax.block_until_ready(out)
    assert out.shape == x.shape
    assert jnp.allclose(out, ref, atol=1e-4, rtol=1e-4), "resident path mismatch"

    # Path 2: force the tiled hidden-reduction path with small tiles so both
    # the row grid and the hidden-axis accumulation into the resident f32
    # output block are exercised (grid = (2, 2) here).
    out_t = feed_forward(x, w1, b1, w2, b2, weights_resident=False,
                         tm_target=8, th_target=128)
    out_t = jax.block_until_ready(out_t)
    assert jnp.allclose(out_t, ref, atol=1e-4, rtol=1e-4), "tiled path mismatch"

    # Path 3: bf16 compute path (x/W1/W2 cast to bf16 for the matmuls, f32
    # accumulation) -- looser tolerance for the reduced-precision matmuls.
    out_bf = feed_forward(x, w1, b1, w2, b2, compute_dtype=jnp.bfloat16,
                          weights_resident=False)
    out_bf = jax.block_until_ready(out_bf)
    assert jnp.allclose(out_bf, ref, atol=5e-2, rtol=5e-2), "bf16 path mismatch"

    print("KERNEL_OK")
</pallas_src>

<mosaic_0001>
module attributes {stable_mosaic.version = 11 : i64} {
  func.func @_ffn_resident_kernel(%arg0: i32, %arg1: memref<16x64xf32, #tpu.memory_space<vmem>>, %arg2: memref<64x256xf32, #tpu.memory_space<vmem>>, %arg3: memref<1x256xf32, #tpu.memory_space<vmem>>, %arg4: memref<256x64xf32, #tpu.memory_space<vmem>>, %arg5: memref<1x64xf32, #tpu.memory_space<vmem>>, %arg6: memref<16x64xf32, #tpu.memory_space<vmem>>) attributes {dimension_semantics = [#tpu.dimension_semantics<parallel>], iteration_bounds = array<i64: 1>, scalar_prefetch = 0 : i64, scratch_operands = 0 : i64, tpu.core_type = #tpu.core_type<tc>, window_params = [{transform_indices = @transform_0, window_bounds = array<i64: 16, 64>}, {pipeline_mode = #tpu.pipeline_mode<synchronous>, transform_indices = @transform_1, window_bounds = array<i64: 64, 256>}, {pipeline_mode = #tpu.pipeline_mode<synchronous>, transform_indices = @transform_2, window_bounds = array<i64: 1, 256>}, {pipeline_mode = #tpu.pipeline_mode<synchronous>, transform_indices = @transform_3, window_bounds = array<i64: 256, 64>}, {pipeline_mode = #tpu.pipeline_mode<synchronous>, transform_indices = @transform_4, window_bounds = array<i64: 1, 64>}, {transform_indices = @transform_5, window_bounds = array<i64: 16, 64>}]} {
    %c0 = arith.constant 0 : index
    %c0_0 = arith.constant 0 : index
    %0 = vector.load %arg1[%c0, %c0_0] : memref<16x64xf32, #tpu.memory_space<vmem>>, vector<16x64xf32>
    %c0_1 = arith.constant 0 : index
    %c0_2 = arith.constant 0 : index
    %1 = vector.load %arg2[%c0_1, %c0_2] : memref<64x256xf32, #tpu.memory_space<vmem>>, vector<64x256xf32>
    %cst = arith.constant dense<0.000000e+00> : vector<16x256xf32>
    %2 = tpu.matmul %0, %1, %cst {dimension_numbers = #tpu.dot_dimension_numbers<[1], [0], [0], [1], [0, 0, 1, 1], [], []>} : vector<16x64xf32>, vector<64x256xf32>, vector<16x256xf32> -> vector<16x256xf32>
    %c0_3 = arith.constant 0 : index
    %c0_4 = arith.constant 0 : index
    %3 = vector.load %arg3[%c0_3, %c0_4] : memref<1x256xf32, #tpu.memory_space<vmem>>, vector<1x256xf32>
    %4 = vector.broadcast %3 : vector<1x256xf32> to vector<16x256xf32>
    %5 = arith.addf %2, %4 : vector<16x256xf32>
    %cst_5 = arith.constant 0.000000e+00 : f32
    %6 = vector.broadcast %cst_5 : f32 to vector<16x256xf32>
    %7 = arith.maximumf %5, %6 : vector<16x256xf32>
    %c0_6 = arith.constant 0 : index
    %c0_7 = arith.constant 0 : index
    %8 = vector.load %arg4[%c0_6, %c0_7] : memref<256x64xf32, #tpu.memory_space<vmem>>, vector<256x64xf32>
    %cst_8 = arith.constant dense<0.000000e+00> : vector<16x64xf32>
    %9 = tpu.matmul %7, %8, %cst_8 {dimension_numbers = #tpu.dot_dimension_numbers<[1], [0], [0], [1], [0, 0, 1, 1], [], []>} : vector<16x256xf32>, vector<256x64xf32>, vector<16x64xf32> -> vector<16x64xf32>
    %c0_9 = arith.constant 0 : index
    %c0_10 = arith.constant 0 : index
    %10 = vector.load %arg5[%c0_9, %c0_10] : memref<1x64xf32, #tpu.memory_space<vmem>>, vector<1x64xf32>
    %11 = vector.broadcast %10 : vector<1x64xf32> to vector<16x64xf32>
    %12 = arith.addf %9, %11 : vector<16x64xf32>
    %c0_11 = arith.constant 0 : index
    %c0_12 = arith.constant 0 : index
    %13 = vector.load %arg6[%c0_11, %c0_12] : memref<16x64xf32, #tpu.memory_space<vmem>>, vector<16x64xf32>
    tpu.vector_store %arg6[%c0_11, %c0_12], %12 {strides = array<i32>} : memref<16x64xf32, #tpu.memory_space<vmem>>, vector<16x64xf32>,
    return
  }
  func.func @transform_0(%arg0: i32) -> (i32, i32) {
    %c0_i32 = arith.constant 0 : i32
    %c0_i32_0 = arith.constant 0 : i32
    return %arg0, %c0_i32 : i32, i32
  }
  func.func @transform_1(%arg0: i32) -> (i32, i32) {
    %c0_i32 = arith.constant 0 : i32
    %c0_i32_0 = arith.constant 0 : i32
    %c0_i32_1 = arith.constant 0 : i32
    return %c0_i32, %c0_i32_0 : i32, i32
  }
  func.func @transform_2(%arg0: i32) -> (i32, i32) {
    %c0_i32 = arith.constant 0 : i32
    %c0_i32_0 = arith.constant 0 : i32
    %c0_i32_1 = arith.constant 0 : i32
    return %c0_i32, %c0_i32_0 : i32, i32
  }
  func.func @transform_3(%arg0: i32) -> (i32, i32) {
    %c0_i32 = arith.constant 0 : i32
    %c0_i32_0 = arith.constant 0 : i32
    %c0_i32_1 = arith.constant 0 : i32
    return %c0_i32, %c0_i32_0 : i32, i32
  }
  func.func @transform_4(%arg0: i32) -> (i32, i32) {
    %c0_i32 = arith.constant 0 : i32
    %c0_i32_0 = arith.constant 0 : i32
    %c0_i32_1 = arith.constant 0 : i32
    return %c0_i32, %c0_i32_0 : i32, i32
  }
  func.func @transform_5(%arg0: i32) -> (i32, i32) {
    %c0_i32 = arith.constant 0 : i32
    %c0_i32_0 = arith.constant 0 : i32
    return %arg0, %c0_i32 : i32, i32
  }
}

</mosaic_0001>

<bundles_post_ra>
// kernel: tpu_custom_call.1
= control target key start
LH: loop header
LB: loop body
LE: loop exit
PB: predicated region body
PF: predicated region fallthrough
CT: control target
= control target key end

     0   :  { %v338_v4 = vmov 0.0   ;;  %vm51_vm0 = vcmask 523264   ;;  %s535_s0 = inlined_call_operand.vmem [shape: f32[16,64], index: 0, kind: input, shape index: {}]   ;;  %s536_s1 = inlined_call_operand.vmem [shape: f32[64,256], index: 1, kind: input, shape index: {}]   ;;  %s537_s2 = inlined_call_operand.vmem [shape: f32[1,256], index: 2, kind: input, shape index: {}]   ;;  %s538_s3 = inlined_call_operand.vmem [shape: f32[256,64], index: 3, kind: input, shape index: {}]   ;;  %s539_s4 = inlined_call_operand.vmem [shape: f32[1,64], index: 4, kind: input, shape index: {}]   ;;  %s540_s5 = inlined_call_operand.hbm [shape: f32[16,64], index: 5, kind: output, shape index: {}]  }
   0x1   :  { %v38_v0 = vld [vmem:[%s536_s1 + $0x78] sm:$0xff]  ;;  %v37_v1 = vld [vmem:[%s536_s1 + $0x70] sm:$0xff]  ;;  %v36_v2 = vld [vmem:[%s536_s1 + $0x68] sm:$0xff]  ;;  %122 = vmatprep.mubr.f32.mxu0 %v338_v4 }
   0x2   :  { %74 = vmatprep.subr.mxu0 %v38_v0  ;;  %v35_v3 = vld [vmem:[%s536_s1 + $0x60] sm:$0xff]  ;;  %v34_v5 = vld [vmem:[%s536_s1 + $0x58] sm:$0xff]  ;;  %v33_v6 = vld [vmem:[%s536_s1 + $0x50] sm:$0xff] }
   0x3   :  { %75 = vmatpush1.msra.mxu0 %v37_v1  ;;  %v32_v7 = vld [vmem:[%s536_s1 + $0x48] sm:$0xff]  ;;  %v31_v8 = vld [vmem:[%s536_s1 + $0x40] sm:$0xff]  ;;  %v30_v9 = vld [vmem:[%s536_s1 + $0x38] sm:$0xff] }
   0x4   :  { %76 = vmatprep.subr.mxu0 %v36_v2  ;;  %v170_v10 = vld [vmem:[%s538_s3 + $0xf8] sm:$0xff]  ;;  %v169_v12 = vld [vmem:[%s538_s3 + $0xf0] sm:$0xff]  ;;  %v28_v15 = vld [vmem:[%s536_s1 + $0x28] sm:$0xff] }
   0x5   :  { %77 = vmatpush1.msra.mxu0 %v35_v3  ;;  %v154_v11 = vld [vmem:[%s538_s3 + $0x78] sm:$0xff]  ;;  %v29_v13 = vld [vmem:[%s536_s1 + $0x30] sm:$0xff]  ;;  %274 = vmatprep.subr.mxu1 %v170_v10  ;;  %v168_v16 = vld [vmem:[%s538_s3 + $0xe8] sm:$0xff] }
   0x6   :  { %78 = vmatprep.subr.mxu0 %v34_v5  ;;  %v153_v14 = vld [vmem:[%s538_s3 + $0x70] sm:$0xff]  ;;  %275 = vmatpush3.msra.mxu1 %v154_v11  ;;  %v27_v17 = vld [vmem:[%s536_s1 + $0x20] sm:$0xff]  ;;  %v152_v18 = vld [vmem:[%s538_s3 + $0x68] sm:$0xff] }
   0x7   :  { %79 = vmatpush1.msra.mxu0 %v33_v6  ;;  %276 = vmatprep.subr.mxu1 %v169_v12  ;;  %v26_v19 = vld [vmem:[%s536_s1 + $0x18] sm:$0xff]  ;;  %v167_v20 = vld [vmem:[%s538_s3 + $0xe0] sm:$0xff]  ;;  %v25_v21 = vld [vmem:[%s536_s1 + $0x10] sm:$0xff] }
   0x8   :  { %80 = vmatprep.subr.mxu0 %v32_v7  ;;  %277 = vmatpush3.msra.mxu1 %v153_v14  ;;  %v151_v22 = vld [vmem:[%s538_s3 + $0x60] sm:$0xff]  ;;  %v24_v23 = vld [vmem:[%s536_s1 + $0x8] sm:$0xff]  ;;  %v166_v24 = vld [vmem:[%s538_s3 + $0xd8] sm:$0xff] }
   0x9   :  { %81 = vmatpush1.msra.mxu0 %v31_v8  ;;  %278 = vmatprep.subr.mxu1 %v168_v16  ;;  %v23_v25 = vld [vmem:[%s536_s1] sm:$0xff]  ;;  %v150_v26 = vld [vmem:[%s538_s3 + $0x58] sm:$0xff]  ;;  %v165_v28 = vld [vmem:[%s538_s3 + $0xd0] sm:$0xff] }
   0xa   :  { %82 = vmatprep.subr.mxu0 %v30_v9  ;;  %279 = vmatpush3.msra.mxu1 %v152_v18  ;;  %v21_v27 = vld [vmem:[%s535_s0] sm:$0xff] }
   0xb   :  { %83 = vmatpush1.msra.mxu0 %v29_v13  ;;  %280 = vmatprep.subr.mxu1 %v167_v20 }
   0xc   :  { %84 = vmatprep.subr.mxu0 %v28_v15  ;;  %281 = vmatpush3.msra.mxu1 %v151_v22 }
   0xd   :  { %85 = vmatpush1.msra.mxu0 %v27_v17 }
   0xe   :  { %86 = vmatprep.subr.mxu0 %v26_v19 }
   0xf   :  { %87 = vmatpush1.msra.mxu0 %v25_v21 }
  0x10   :  { %10 = vsyncpa [#allocation3], 0  ;;  %88 = vmatprep.subr.mxu0 %v24_v23  ;;  %282 = vmatprep.subr.mxu1 %v166_v24  ;;  %v149_v29 = vld [vmem:[%s538_s3 + $0x50] sm:$0xff]  ;;  %v164_v30 = vld [vmem:[%s538_s3 + $0xc8] sm:$0xff]  ;;  %v41_v51 = vlaneseq  ;;  %s339_s16 = smov [#allocation2]  }
  0x11   :  { %89 = vmatpush1.msra.mxu0 %v23_v25  ;;  %283 = vmatpush3.msra.mxu1 %v150_v26  ;;  %v148_v31 = vld [vmem:[%s538_s3 + $0x48] sm:$0xff]  ;;  %v163_v33 = vld [vmem:[%s538_s3 + $0xc0] sm:$0xff]  ;;  %v162_v35 = vld [vmem:[%s538_s3 + $0xb8] sm:$0xff]  ;;  %s260_s17 = sshll.u32 %s339_s16, 4  ;;  %s261_s17 = int_to_ptr.vmem [resolvable:$true] %s260_s17 }
  0x12   :  { %271 = vmatmul.mubr.msk.f32.vlgmr.msra.gmra.mxu0 %vm51_vm0, %v21_v27  ;;  %284 = vmatprep.subr.mxu1 %v165_v28  ;;  %v22_v32 = vld [vmem:[%s535_s0 + $0x8] sm:$0xff]  ;;  %v147_v34 = vld [vmem:[%s538_s3 + $0x40] sm:$0xff]  ;;  %v146_v36 = vld [vmem:[%s538_s3 + $0x38] sm:$0xff]  ;;  %v42_v52 = vshrl.u32 %v41_v51, 7  ;;  %s316_s18 = scalar_lea.vmem %s261_s17, 256  ;;  %p321_p1 = scmp.lt.s32.totalorder %s261_s17, %s261_s17 }
  0x13   :  { %128 = vmatprep.mubr.f32.mxu0 %v338_v4  ;;  %285 = vmatpush3.msra.mxu1 %v149_v29  ;;  %v161_v37 = vld [vmem:[%s538_s3 + $0xb0] sm:$0xff]  ;;  %v160_v39 = vld [vmem:[%s538_s3 + $0xa8] sm:$0xff]  ;;  %v159_v41 = vld [vmem:[%s538_s3 + $0xa0] sm:$0xff]  ;;  %p317_p0 = scmp.ne.s32.totalorder %s261_s17, %s316_s18  ;;  %p322_p2 = scmp.lt.s32.totalorder %s316_s18, %s316_s18 }
  0x14   :  { %286 = vmatprep.subr.mxu1 %v164_v30  ;;  %v145_v38 = vld [vmem:[%s538_s3 + $0x30] sm:$0xff]  ;;  %v144_v40 = vld [vmem:[%s538_s3 + $0x28] sm:$0xff]  ;;  %v143_v42 = vld [vmem:[%s538_s3 + $0x20] sm:$0xff]  ;;  %v43_v53 = vsub.s32 0, %v42_v52  ;;  %v47_v55 = vsub.s32 1, %v42_v52 }
  0x15   :  { %287 = vmatpush3.msra.mxu1 %v148_v31  ;;  %v158_v43 = vld [vmem:[%s538_s3 + $0x98] sm:$0xff]  ;;  %v157_v45 = vld [vmem:[%s538_s3 + $0x90] sm:$0xff]  ;;  %v156_v47 = vld [vmem:[%s538_s3 + $0x88] sm:$0xff]  ;;  %p323_p3 = por %p322_p2, %p321_p1 }
  0x16   :  { %272 = vmatmul.mubr.msk.f32.gmra.mxu0 %vm51_vm0, %v22_v32  ;;  %288 = vmatprep.subr.mxu1 %v163_v33  ;;  %v142_v44 = vld [vmem:[%s538_s3 + $0x18] sm:$0xff]  ;;  %v141_v46 = vld [vmem:[%s538_s3 + $0x10] sm:$0xff]  ;;  %v140_v48 = vld [vmem:[%s538_s3 + $0x8] sm:$0xff] }
  0x17   :  { %289 = vmatpush3.msra.mxu1 %v147_v34  ;;  %v155_v49 = vld [vmem:[%s538_s3 + $0x80] sm:$0xff]  ;;  %p324_p4 = pnand %p323_p3, %p317_p0 }
  0x18   :  { %290 = vmatprep.subr.mxu1 %v162_v35  ;;  %v139_v50 = vld [vmem:[%s538_s3] sm:$0xff] }
  0x19   :  { %291 = vmatpush3.msra.mxu1 %v146_v36  ;;  %v39_v54 = vld [vmem:[%s537_s2] sm:$0x3] }
  0x1a   :  { %292 = vmatprep.subr.mxu1 %v161_v37  ;;  %v44_v56 = vrot.slane %v39_v54, %v43_v53  ;;  %v48_v57 = vrot.slane %v39_v54, %v47_v55  ;;  %v273_v7 = vld [vmem:[%s539_s4] ss:$0 sm:$0xff] }
  0x1b   :  { %293 = vmatpush3.msra.mxu1 %v145_v38 }
  0x1c   :  { %294 = vmatprep.subr.mxu1 %v160_v39 }
  0x1d   :  { %295 = vmatpush3.msra.mxu1 %v144_v40 }
  0x1e   :  { %296 = vmatprep.subr.mxu1 %v159_v41 }
  0x1f   :  { %297 = vmatpush3.msra.mxu1 %v143_v42 }
  0x20   :  { %298 = vmatprep.subr.mxu1 %v158_v43 }
  0x21   :  { %299 = vmatpush3.msra.mxu1 %v142_v44 }
  0x22   :  { %300 = vmatprep.subr.mxu1 %v157_v45 }
  0x23   :  { %301 = vmatpush3.msra.mxu1 %v141_v46 }
  0x24   :  { %302 = vmatprep.subr.mxu1 %v156_v47 }
  0x25   :  { %303 = vmatpush3.msra.mxu1 %v140_v48 }
  0x26   :  { %304 = vmatprep.subr.mxu1 %v155_v49 }
  0x27   :  { %305 = vmatpush3.msra.mxu1 %v139_v50 }
  0xd2   :  { %v124_v58 = vpop.f32.mrf.mxu0 }
  0xd3   :  { %v125_v59 = vadd.f32 %v124_v58, %v44_v56 }
  0xd4   :  { %v126_v60 = vpop.f32.mrf.mxu0 }
  0xd5   :  { %v127_v61 = vadd.f32 %v126_v60, %v48_v57  ;;  %v135_v0 = vmax.f32 %v125_v59, 0.0 }
  0xd6   :  { %v130_v62 = vpop.f32.mrf.mxu0 }
  0xd7   :  { %v136_v63 = vmax.f32 %v127_v61, 0.0  ;;  %v131_v1 = vadd.f32 %v130_v62, %v44_v56 }
  0xd8   :  { %v132_v2 = vpop.f32.mrf.mxu0 }
  0xd9   :  { %v133_v3 = vadd.f32 %v132_v2, %v48_v57  ;;  %242 = vmatprep.mubr.f32.mxu1 %v136_v63  ;;  %v137_v5 = vmax.f32 %v131_v1, 0.0 }
  0xda   :  { %243 = vmatmul.mubr.f32.vlgmr.msra.gmra.mxu1 %v135_v0 }
  0xdb   :  { %v138_v4 = vmax.f32 %v133_v3, 0.0 }
  0xdd   :  { %247 = vmatprep.mubr.f32.mxu1 %v138_v4 }
  0xde   :  { %248 = vmatmul.mubr.f32.gmra.mxu1 %v137_v5 }
 0x19a   :  { %v306_v6 = vpop.f32.mrf.mxu1 }
 0x19c   :  { %v307_v8 = vpop.f32.mrf.mxu1 }
 0x19d   :  { %v308_v9 = vadd.f32 %v307_v8, %v306_v6 }
 0x19e   :  { %v309_v10 = vpop.f32.mrf.mxu1 }
 0x19f   :  { %v245_v11 = vadd.f32 %v308_v9, %v273_v7 }
 0x1a0   :  { %v310_v12 = vpop.f32.mrf.mxu1 }
 0x1a1   :  { %253 = vst.msk [vmem:[#allocation2] sm:$0xff] %vm51_vm0, %v245_v11  ;;  %v311_v13 = vadd.f32 %v310_v12, %v309_v10 }
 0x1a3   :  { %v250_v14 = vadd.f32 %v311_v13, %v273_v7 }
 0x1a5   :  { %254 = vst.msk [vmem:[#allocation2 + $0x8] sm:$0xff] %vm51_vm0, %v250_v14 }
 0x1a6   :  { %327 = shalt.err (!%p324_p4)
}
 0x1a7   :  { %s340_s4 = smov 128   ;;  %s341_s19 = smov 8  }
 0x1a8   :  { %266 = dma.vmem_to_hbm [thread:$0]  %s261_s17, 256, %s540_s5, [#allocation3], %s340_s4, %s340_s4, %s341_s19  }
 0x1a9   :  { %336 = dma.done.wait [#allocation3], 256  }
 0x1aa   :  { %337 = vsyncadd [#allocation3], 4294967040 }
 0x1ab   :  { %270 = vsyncpa [#allocation3], 1 }

</bundles_post_ra>
